<compile_context>
chip_gen: v6e
topology: v6e:2x2x1
jax: 0.10.0
libtpu: 0.0.40
codegen_flags: <defaults>
</compile_context>

<pallas_src>
import jax
import jax.numpy as jnp
from jax.experimental import pallas as pl
from jax.experimental.pallas import tpu as pltpu

IN_DIM = 28 * 28   # 784
H1 = 128
H2 = 64
H2_PAD = 128       # fc2 output lane-padded 64 -> 128
OUT = 10
OUT_PAD = 128      # fc3 output lane-padded 10 -> 128


def mlp_kernel(x_ref, w1_ref, b1_ref, w2_ref, b2_ref, w3_ref, b3_ref, o_ref):
    # x arrives as f32 (no wrapper-side cast pass); cast to bf16 in-register.
    x = x_ref[...].astype(jnp.bfloat16)
    # fc1 + relu (bf16 operands, f32 accumulation on the MXU)
    h1 = jnp.dot(x, w1_ref[...], preferred_element_type=jnp.float32)
    h1 = jnp.maximum(h1 + b1_ref[...], 0.0)
    # fc2 + relu (padded columns of w2/b2 are zero -> padded h2 columns stay 0)
    h2 = jnp.dot(h1.astype(jnp.bfloat16), w2_ref[...],
                 preferred_element_type=jnp.float32)
    h2 = jnp.maximum(h2 + b2_ref[...], 0.0)
    # fc3 (no activation); padded rows/cols of w3, b3 are zero
    h3 = jnp.dot(h2.astype(jnp.bfloat16), w3_ref[...],
                 preferred_element_type=jnp.float32)
    o_ref[...] = (h3 + b3_ref[...]).astype(o_ref.dtype)   # bf16 store, lane-dense


def _round_up(x, m):
    return ((x + m - 1) // m) * m


def _pick_tb(batch):
    """Batch-tile selection.

    * multiple of 16 (bf16 sublane packing -> unmasked sublane stores),
    * capped at 1024 rows: double-buffered f32 x (~6.4 MB) + f32 intermediates
      + resident weights stay ~10 MB, safe even on v7x's 64 MiB per-TC VMEM,
    * capped at ~batch/2 so the "parallel" grid axis has >= 2 steps and both
      of v7x's TensorCores get work (harmless on single-TC v5e/v6e),
    * largest candidate whose zero-padding waste is bounded by max(64, batch/8)
      rows, so e.g. batch=520 pads to 576 (tb=64), not 1024.
    """
    if batch <= 16:
        return 16
    max_tb = min(1024, _round_up((batch + 1) // 2, 16))
    max_waste = max(64, batch // 8)
    for t in (1024, 512, 256, 128, 64, 32, 16):
        if t <= max_tb and (-batch) % t <= max_waste:
            return t
    return 16


def init_params(key):
    """f32 params mimicking torch.nn.Linear default init (uniform +/- 1/sqrt(fan_in)).

    Weights stored as [in, out] so the kernel computes x @ W.
    """
    def linear(key, fan_in, fan_out):
        kw, kb = jax.random.split(key)
        bound = 1.0 / jnp.sqrt(jnp.float32(fan_in))
        w = jax.random.uniform(kw, (fan_in, fan_out), jnp.float32, -bound, bound)
        b = jax.random.uniform(kb, (1, fan_out), jnp.float32, -bound, bound)
        return w, b

    k1, k2, k3 = jax.random.split(key, 3)
    w1, b1 = linear(k1, IN_DIM, H1)
    w2, b2 = linear(k2, H1, H2)
    w3, b3 = linear(k3, H2, OUT)
    return (w1, b1, w2, b2, w3, b3)


def prepare_params(params):
    """Lane-pad the narrow layers to 128 and cast weights to bf16 (biases f32).

    Single source of truth for the zero padding that keeps the padded h2/h3
    columns exactly zero through bias + ReLU.
    """
    w1, b1, w2, b2, w3, b3 = params
    w2p = jnp.zeros((H1, H2_PAD), jnp.float32).at[:, :H2].set(w2)
    b2p = jnp.zeros((1, H2_PAD), jnp.float32).at[:, :H2].set(b2)
    w3p = jnp.zeros((H2_PAD, OUT_PAD), jnp.float32).at[:H2, :OUT].set(w3)
    b3p = jnp.zeros((1, OUT_PAD), jnp.float32).at[:, :OUT].set(b3)
    return (w1.astype(jnp.bfloat16), b1.astype(jnp.float32),
            w2p.astype(jnp.bfloat16), b2p.astype(jnp.float32),
            w3p.astype(jnp.bfloat16), b3p.astype(jnp.float32))


def simple_nn_forward(x, kparams):
    """Forward: view(-1, 784) -> fc1 -> relu -> fc2 -> relu -> fc3."""
    w1, b1, w2, b2, w3, b3 = kparams

    x2d = x.reshape(-1, IN_DIM)           # keep input dtype; bf16 cast is in-kernel
    batch = x2d.shape[0]

    tb = _pick_tb(batch)
    padded_batch = _round_up(batch, tb)
    if padded_batch != batch:
        # Padding rows are zeros; they never mix with real rows (no cross-row
        # reduction in the kernel) and are sliced off below.
        x2d = jnp.pad(x2d, ((0, padded_batch - batch), (0, 0)))

    grid = (padded_batch // tb,)

    def resident(shape):
        # Constant index_map -> block is identical across grid steps and stays
        # resident in VMEM (no per-tile re-DMA of weights / biases).
        # NOTE: default double-buffering of these small resident blocks costs
        # only ~270 KB of VMEM, so we keep the default pipeline mode.
        return pl.BlockSpec(shape, lambda i: (0, 0))

    x_bytes = x2d.size * x2d.dtype.itemsize
    flops = 2 * padded_batch * (IN_DIM * H1 + H1 * H2_PAD + H2_PAD * OUT_PAD)
    bytes_accessed = (
        x_bytes                                        # activations in (f32)
        + (w1.size + w2.size + w3.size) * 2            # bf16 resident weights
        + (b1.size + b2.size + b3.size) * 4            # f32 biases
        + padded_batch * OUT_PAD * 2                   # bf16 output
    )

    out = pl.pallas_call(
        mlp_kernel,
        out_shape=jax.ShapeDtypeStruct((padded_batch, OUT_PAD), jnp.bfloat16),
        grid=grid,
        in_specs=[
            pl.BlockSpec((tb, IN_DIM), lambda i: (i, 0)),  # x: tiled over batch
            resident((IN_DIM, H1)),                        # w1 (resident)
            resident((1, H1)),                             # b1
            resident((H1, H2_PAD)),                        # w2
            resident((1, H2_PAD)),                         # b2
            resident((H2_PAD, OUT_PAD)),                   # w3
            resident((1, OUT_PAD)),                        # b3
        ],
        out_specs=pl.BlockSpec((tb, OUT_PAD), lambda i: (i, 0)),
        compiler_params=pltpu.CompilerParams(
            dimension_semantics=("parallel",),
            # Explicit limit so the same (possibly 1024-row) tile also fits
            # v5e's 16 MiB scoped-VMEM default; well under every gen's physical.
            vmem_limit_bytes=32 * 1024 * 1024),
        cost_estimate=pl.CostEstimate(
            flops=flops, transcendentals=0, bytes_accessed=bytes_accessed),
    )(x2d, w1, b1, w2, b2, w3, b3)

    # Drop batch padding and lane padding; present f32 to callers.
    return out[:batch, :OUT].astype(jnp.float32)


if __name__ == "__main__":
    key = jax.random.PRNGKey(0)
    k_params, k_x = jax.random.split(key)

    params = init_params(k_params)        # f32 master params
    kparams = prepare_params(params)      # lane-padded bf16 kernel params

    # Small MNIST-like batch: [batch=2, channels=1, H=28, W=28] -> [2, 784].
    x = jax.random.normal(k_x, (2, 1, 28, 28), jnp.float32)

    out = simple_nn_forward(x, kparams)
    out = jax.block_until_ready(out)

    # Pure-JAX f32 reference of the original SimpleNN forward (f32 params).
    w1, b1, w2, b2, w3, b3 = params
    x2d = x.reshape(-1, IN_DIM)
    ref = jnp.maximum(x2d @ w1 + b1, 0.0)
    ref = jnp.maximum(ref @ w2 + b2, 0.0)
    ref = ref @ w3 + b3

    assert out.shape == (2, OUT)
    # Tolerance loosened because the kernel uses bf16 weights/activations and a
    # bf16 output store (f32 MXU accumulation); error vs f32 reference ~1e-2.
    assert jnp.allclose(out, ref, atol=5e-2, rtol=5e-2), float(
        jnp.max(jnp.abs(out - ref)))

    print("KERNEL_OK")
</pallas_src>

<mosaic_0001>
module attributes {stable_mosaic.version = 11 : i64} {
  func.func @mlp_kernel(%arg0: i32, %arg1: memref<16x784xf32, #tpu.memory_space<vmem>>, %arg2: memref<784x128xbf16, #tpu.memory_space<vmem>>, %arg3: memref<1x128xf32, #tpu.memory_space<vmem>>, %arg4: memref<128x128xbf16, #tpu.memory_space<vmem>>, %arg5: memref<1x128xf32, #tpu.memory_space<vmem>>, %arg6: memref<128x128xbf16, #tpu.memory_space<vmem>>, %arg7: memref<1x128xf32, #tpu.memory_space<vmem>>, %arg8: memref<16x128xbf16, #tpu.memory_space<vmem>>) attributes {dimension_semantics = [#tpu.dimension_semantics<parallel>], iteration_bounds = array<i64: 1>, scalar_prefetch = 0 : i64, scratch_operands = 0 : i64, tpu.core_type = #tpu.core_type<tc>, window_params = [{transform_indices = @transform_0, window_bounds = array<i64: 16, 784>}, {pipeline_mode = #tpu.pipeline_mode<synchronous>, transform_indices = @transform_1, window_bounds = array<i64: 784, 128>}, {pipeline_mode = #tpu.pipeline_mode<synchronous>, transform_indices = @transform_2, window_bounds = array<i64: 1, 128>}, {pipeline_mode = #tpu.pipeline_mode<synchronous>, transform_indices = @transform_3, window_bounds = array<i64: 128, 128>}, {pipeline_mode = #tpu.pipeline_mode<synchronous>, transform_indices = @transform_4, window_bounds = array<i64: 1, 128>}, {pipeline_mode = #tpu.pipeline_mode<synchronous>, transform_indices = @transform_5, window_bounds = array<i64: 128, 128>}, {pipeline_mode = #tpu.pipeline_mode<synchronous>, transform_indices = @transform_6, window_bounds = array<i64: 1, 128>}, {transform_indices = @transform_7, window_bounds = array<i64: 16, 128>}]} {
    %c0 = arith.constant 0 : index
    %c0_0 = arith.constant 0 : index
    %0 = vector.load %arg1[%c0, %c0_0] : memref<16x784xf32, #tpu.memory_space<vmem>>, vector<16x784xf32>
    %1 = arith.truncf %0 : vector<16x784xf32> to vector<16x784xbf16>
    %c0_1 = arith.constant 0 : index
    %c0_2 = arith.constant 0 : index
    %2 = vector.load %arg2[%c0_1, %c0_2] : memref<784x128xbf16, #tpu.memory_space<vmem>>, vector<784x128xbf16>
    %cst = arith.constant dense<0.000000e+00> : vector<16x128xf32>
    %3 = tpu.matmul %1, %2, %cst {dimension_numbers = #tpu.dot_dimension_numbers<[1], [0], [0], [1], [0, 0, 1, 1], [], []>} : vector<16x784xbf16>, vector<784x128xbf16>, vector<16x128xf32> -> vector<16x128xf32>
    %c0_3 = arith.constant 0 : index
    %c0_4 = arith.constant 0 : index
    %4 = vector.load %arg3[%c0_3, %c0_4] : memref<1x128xf32, #tpu.memory_space<vmem>>, vector<1x128xf32>
    %5 = vector.broadcast %4 : vector<1x128xf32> to vector<16x128xf32>
    %6 = arith.addf %3, %5 : vector<16x128xf32>
    %cst_5 = arith.constant 0.000000e+00 : f32
    %7 = vector.broadcast %cst_5 : f32 to vector<16x128xf32>
    %8 = arith.maximumf %6, %7 : vector<16x128xf32>
    %9 = arith.truncf %8 : vector<16x128xf32> to vector<16x128xbf16>
    %c0_6 = arith.constant 0 : index
    %c0_7 = arith.constant 0 : index
    %10 = vector.load %arg4[%c0_6, %c0_7] : memref<128x128xbf16, #tpu.memory_space<vmem>>, vector<128x128xbf16>
    %cst_8 = arith.constant dense<0.000000e+00> : vector<16x128xf32>
    %11 = tpu.matmul %9, %10, %cst_8 {dimension_numbers = #tpu.dot_dimension_numbers<[1], [0], [0], [1], [0, 0, 1, 1], [], []>} : vector<16x128xbf16>, vector<128x128xbf16>, vector<16x128xf32> -> vector<16x128xf32>
    %c0_9 = arith.constant 0 : index
    %c0_10 = arith.constant 0 : index
    %12 = vector.load %arg5[%c0_9, %c0_10] : memref<1x128xf32, #tpu.memory_space<vmem>>, vector<1x128xf32>
    %13 = vector.broadcast %12 : vector<1x128xf32> to vector<16x128xf32>
    %14 = arith.addf %11, %13 : vector<16x128xf32>
    %cst_11 = arith.constant 0.000000e+00 : f32
    %15 = vector.broadcast %cst_11 : f32 to vector<16x128xf32>
    %16 = arith.maximumf %14, %15 : vector<16x128xf32>
    %17 = arith.truncf %16 : vector<16x128xf32> to vector<16x128xbf16>
    %c0_12 = arith.constant 0 : index
    %c0_13 = arith.constant 0 : index
    %18 = vector.load %arg6[%c0_12, %c0_13] : memref<128x128xbf16, #tpu.memory_space<vmem>>, vector<128x128xbf16>
    %cst_14 = arith.constant dense<0.000000e+00> : vector<16x128xf32>
    %19 = tpu.matmul %17, %18, %cst_14 {dimension_numbers = #tpu.dot_dimension_numbers<[1], [0], [0], [1], [0, 0, 1, 1], [], []>} : vector<16x128xbf16>, vector<128x128xbf16>, vector<16x128xf32> -> vector<16x128xf32>
    %c0_15 = arith.constant 0 : index
    %c0_16 = arith.constant 0 : index
    %20 = vector.load %arg7[%c0_15, %c0_16] : memref<1x128xf32, #tpu.memory_space<vmem>>, vector<1x128xf32>
    %21 = vector.broadcast %20 : vector<1x128xf32> to vector<16x128xf32>
    %22 = arith.addf %19, %21 : vector<16x128xf32>
    %23 = arith.truncf %22 : vector<16x128xf32> to vector<16x128xbf16>
    %c0_17 = arith.constant 0 : index
    %c0_18 = arith.constant 0 : index
    %24 = vector.load %arg8[%c0_17, %c0_18] : memref<16x128xbf16, #tpu.memory_space<vmem>>, vector<16x128xbf16>
    tpu.vector_store %arg8[%c0_17, %c0_18], %23 {strides = array<i32>} : memref<16x128xbf16, #tpu.memory_space<vmem>>, vector<16x128xbf16>,
    return
  }
  func.func @transform_0(%arg0: i32) -> (i32, i32) {
    %c0_i32 = arith.constant 0 : i32
    %c0_i32_0 = arith.constant 0 : i32
    return %arg0, %c0_i32 : i32, i32
  }
  func.func @transform_1(%arg0: i32) -> (i32, i32) {
    %c0_i32 = arith.constant 0 : i32
    %c0_i32_0 = arith.constant 0 : i32
    %c0_i32_1 = arith.constant 0 : i32
    return %c0_i32, %c0_i32_0 : i32, i32
  }
  func.func @transform_2(%arg0: i32) -> (i32, i32) {
    %c0_i32 = arith.constant 0 : i32
    %c0_i32_0 = arith.constant 0 : i32
    %c0_i32_1 = arith.constant 0 : i32
    return %c0_i32, %c0_i32_0 : i32, i32
  }
  func.func @transform_3(%arg0: i32) -> (i32, i32) {
    %c0_i32 = arith.constant 0 : i32
    %c0_i32_0 = arith.constant 0 : i32
    %c0_i32_1 = arith.constant 0 : i32
    return %c0_i32, %c0_i32_0 : i32, i32
  }
  func.func @transform_4(%arg0: i32) -> (i32, i32) {
    %c0_i32 = arith.constant 0 : i32
    %c0_i32_0 = arith.constant 0 : i32
    %c0_i32_1 = arith.constant 0 : i32
    return %c0_i32, %c0_i32_0 : i32, i32
  }
  func.func @transform_5(%arg0: i32) -> (i32, i32) {
    %c0_i32 = arith.constant 0 : i32
    %c0_i32_0 = arith.constant 0 : i32
    %c0_i32_1 = arith.constant 0 : i32
    return %c0_i32, %c0_i32_0 : i32, i32
  }
  func.func @transform_6(%arg0: i32) -> (i32, i32) {
    %c0_i32 = arith.constant 0 : i32
    %c0_i32_0 = arith.constant 0 : i32
    %c0_i32_1 = arith.constant 0 : i32
    return %c0_i32, %c0_i32_0 : i32, i32
  }
  func.func @transform_7(%arg0: i32) -> (i32, i32) {
    %c0_i32 = arith.constant 0 : i32
    %c0_i32_0 = arith.constant 0 : i32
    return %arg0, %c0_i32 : i32, i32
  }
}

</mosaic_0001>

<bundles_post_ra>
// kernel: tpu_custom_call.1
= control target key start
LH: loop header
LB: loop body
LE: loop exit
PB: predicated region body
PF: predicated region fallthrough
CT: control target
= control target key end

     0   :  { %12 = vsyncpa [#allocation3], 0  ;;  %s1434_s0 = inlined_call_operand.hbm [shape: f32[16,784], index: 0, kind: input, shape index: {}]   ;;  %s1435_s1 = inlined_call_operand.hbm [shape: bf16[784,128], index: 1, kind: input, shape index: {}]   ;;  %s1436_s2 = inlined_call_operand.vmem [shape: f32[1,128], index: 2, kind: input, shape index: {}]   ;;  %s1437_s3 = inlined_call_operand.hbm [shape: bf16[128,128], index: 3, kind: input, shape index: {}]   ;;  %s1438_s4 = inlined_call_operand.vmem [shape: f32[1,128], index: 4, kind: input, shape index: {}]   ;;  %s1439_s5 = inlined_call_operand.hbm [shape: bf16[128,128], index: 5, kind: input, shape index: {}]   ;;  %s1440_s6 = inlined_call_operand.vmem [shape: f32[1,128], index: 6, kind: input, shape index: {}]   ;;  %s1441_s7 = inlined_call_operand.hbm [shape: bf16[16,128], index: 7, kind: output, shape index: {}]  }
   0x1   :  { %13 = vsyncpa [#allocation6], 0 }
   0x2   :  { %14 = vsyncpa [#allocation9], 0 }
   0x3   :  { %15 = vsyncpa [#allocation4], 0  ;;  %s1324_s24 = smov [#allocation5]  }
   0x4   :  { %s33_s25 = sshll.u32 %s1324_s24, 4  ;;  %s34_s25 = int_to_ptr.vmem [resolvable:$true] %s33_s25 }
   0x5   :  { %s1224_s26 = scalar_lea.vmem %s34_s25, 6272  ;;  %p1229_p1 = scmp.lt.s32.totalorder %s34_s25, %s34_s25 }
   0x6   :  { %p1225_p0 = scmp.ne.s32.totalorder %s34_s25, %s1224_s26  ;;  %p1230_p2 = scmp.lt.s32.totalorder %s1224_s26, %s1224_s26 }
   0x8   :  { %p1231_p3 = por %p1230_p2, %p1229_p1 }
   0xa   :  { %p1232_p4 = pnand %p1231_p3, %p1225_p0 }
   0xc   :  { %1235 = shalt.err (!%p1232_p4)
}
   0xd   :  { %s1325_s27 = smov 64   ;;  %s1326_s28 = smov 4  }
   0xe   :  { %39 = dma.hbm_to_vmem [thread:$0]  %s1435_s1, 6272, %s34_s25, [#allocation6], %s1325_s27, %s1325_s27, %s1326_s28  }
   0xf   :  { %s1327_s8 = smov [#allocation2]  }
  0x10   :  { %s21_s9 = sshll.u32 %s1327_s8, 4  ;;  %s22_s9 = int_to_ptr.vmem [resolvable:$true] %s21_s9 }
  0x11   :  { %s1244_s10 = scalar_lea.vmem %s22_s9, 1792  ;;  %p1249_p6 = scmp.lt.s32.totalorder %s22_s9, %s22_s9 }
  0x12   :  { %p1245_p5 = scmp.ne.s32.totalorder %s22_s9, %s1244_s10  ;;  %p1250_p7 = scmp.lt.s32.totalorder %s1244_s10, %s1244_s10 }
  0x14   :  { %p1251_p8 = por %p1250_p7, %p1249_p6 }
  0x16   :  { %p1252_p9 = pnand %p1251_p8, %p1245_p5 }
  0x18   :  { %1255 = shalt.err (!%p1252_p9)
}
  0x19   :  { %s1328_s11 = smov 896   ;;  %s1329_s12 = smov 56  }
  0x1a   :  { %27 = dma.hbm_to_vmem [thread:$0]  %s1434_s0, 1792, %s22_s9, [#allocation3], %s1328_s11, %s1328_s11, %s1329_s12  }
  0x1b   :  { %s1330_s15 = smov [#allocation7]   ;;  %s1331_s17 = smov [#allocation8]  }
  0x1c   :  { %s47_s16 = sshll.u32 %s1330_s15, 4  ;;  %s61_s1 = sshll.u32 %s1331_s17, 4  ;;  %s48_s16 = int_to_ptr.vmem [resolvable:$true] %s47_s16  ;;  %s62_s1 = int_to_ptr.vmem [resolvable:$true] %s61_s1 }
  0x1d   :  { %s1264_s18 = scalar_lea.vmem %s48_s16, 1024  ;;  %p1269_p11 = scmp.lt.s32.totalorder %s48_s16, %s48_s16 }
  0x1e   :  { %p1265_p10 = scmp.ne.s32.totalorder %s48_s16, %s1264_s18  ;;  %p1270_p12 = scmp.lt.s32.totalorder %s1264_s18, %s1264_s18 }
  0x20   :  { %p1271_p13 = por %p1270_p12, %p1269_p11 }
  0x22   :  { %p1272_p0 = pnand %p1271_p13, %p1265_p10 }
  0x24   :  { %1275 = shalt.err (!%p1272_p0)
}
  0x25   :  { %53 = dma.hbm_to_vmem [thread:$0]  %s1437_s3, 1024, %s48_s16, [#allocation6], %s1325_s27, %s1325_s27, %s1326_s28  }
  0x26   :  { %s1284_s0 = scalar_lea.vmem %s62_s1, 1024  ;;  %p1289_p2 = scmp.lt.s32.totalorder %s62_s1, %s62_s1 }
  0x27   :  { %p1285_p1 = scmp.ne.s32.totalorder %s62_s1, %s1284_s0  ;;  %p1290_p3 = scmp.lt.s32.totalorder %s1284_s0, %s1284_s0 }
  0x29   :  { %p1291_p4 = por %p1290_p3, %p1289_p2 }
  0x2b   :  { %p1292_p5 = pnand %p1291_p4, %p1285_p1 }
  0x2d   :  { %1295 = shalt.err (!%p1292_p5)
}
  0x2e   :  { %67 = dma.hbm_to_vmem [thread:$0]  %s1439_s5, 1024, %s62_s1, [#allocation9], %s1325_s27, %s1325_s27, %s1326_s28  }
  0x2f   :  { %1316 = dma.done.wait [#allocation3], 1792  }
  0x30   :  { %1317 = vsyncadd [#allocation3], 4294965504 }
  0x31   :  { %1318 = dma.done.wait [#allocation6], 7296  }
  0x32   :  { %1319 = vsyncadd [#allocation6], 4294960000 }
  0x33   :  { %1320 = dma.done.wait [#allocation9], 1024  }
  0x34   :  { %1321 = vsyncadd [#allocation9], 4294966272  ;;  %v1151_v0 = vld [vmem:[#allocation5 + $0x78] sm:$0xff]   ;;  %v1155_v4 = vld [vmem:[#allocation5 + $0x70] sm:$0xff]   ;;  %v1332_v43 = vmov 0.0   ;;  %vm1333_vm0 = vmmov 0  }
  0x35   :  { %v1152_v1 = vld [vmem:[#allocation5 + $0x38] sm:$0xff]   ;;  %1008 = vmatprep.subr.bf16.mxu0 %v1151_v0  ;;  %v1156_v5 = vld [vmem:[#allocation5 + $0x30] sm:$0xff]   ;;  %v1159_v8 = vld [vmem:[#allocation5 + $0x68] sm:$0xff]   ;;  %vm503_vm1 = vcmask 130048   ;;  %s1334_s26 = smov [#allocation10]  }
  0x36   :  { %v1153_v2 = vld [vmem:[#allocation5 + $0xf8] sm:$0xff]   ;;  %1009 = vmatpush3.bf16.msra.mxu0 %v1152_v1  ;;  %v1157_v6 = vld [vmem:[#allocation5 + $0xf0] sm:$0xff]   ;;  %v1160_v9 = vld [vmem:[#allocation5 + $0x28] sm:$0xff]   ;;  %s916_s29 = sshll.u32 %s1334_s26, 4  ;;  %s917_s29 = int_to_ptr.vmem [resolvable:$true] %s916_s29 }
  0x37   :  { %v1154_v3 = vld [vmem:[#allocation5 + $0xb8] sm:$0xff]   ;;  %1030 = vmatprep.subr.bf16.mxu1 %v1153_v2  ;;  %1010 = vmatprep.subr.bf16.mxu0 %v1155_v4  ;;  %v1158_v7 = vld [vmem:[#allocation5 + $0xb0] sm:$0xff]   ;;  %v1161_v10 = vld [vmem:[#allocation5 + $0xe8] sm:$0xff]   ;;  %p1301_p7 = scmp.lt.s32.totalorder %s917_s29, %s917_s29 }
  0x38   :  { %1031 = vmatpush3.bf16.msra.mxu1 %v1154_v3  ;;  %v1162_v11 = vld [vmem:[#allocation5 + $0xa8] sm:$0xff]   ;;  %v1163_v12 = vld [vmem:[#allocation5 + $0x60] sm:$0xff]   ;;  %v1167_v16 = vld [vmem:[#allocation5 + $0x58] sm:$0xff]  }
  0x39   :  { %1032 = vmatprep.subr.bf16.mxu1 %v1157_v6  ;;  %v1164_v13 = vld [vmem:[#allocation5 + $0x20] sm:$0xff]   ;;  %v1168_v17 = vld [vmem:[#allocation5 + $0x18] sm:$0xff]   ;;  %v1171_v20 = vld [vmem:[#allocation5 + $0x50] sm:$0xff]  }
  0x3a   :  { %1011 = vmatpush3.bf16.msra.mxu0 %v1156_v5  ;;  %v1165_v14 = vld [vmem:[#allocation5 + $0xe0] sm:$0xff]   ;;  %v1169_v18 = vld [vmem:[#allocation5 + $0xd8] sm:$0xff]   ;;  %v1172_v21 = vld [vmem:[#allocation5 + $0x10] sm:$0xff]  }
  0x3b   :  { %1012 = vmatprep.subr.bf16.mxu0 %v1159_v8  ;;  %v1166_v15 = vld [vmem:[#allocation5 + $0xa0] sm:$0xff]   ;;  %v1170_v19 = vld [vmem:[#allocation5 + $0x98] sm:$0xff]   ;;  %v1173_v22 = vld [vmem:[#allocation5 + $0xd0] sm:$0xff]  }
  0x3c   :  { %1033 = vmatpush3.bf16.msra.mxu1 %v1158_v7  ;;  %v1174_v23 = vld [vmem:[#allocation5 + $0x90] sm:$0xff]   ;;  %v1175_v24 = vld [vmem:[#allocation5 + $0x48] sm:$0xff]   ;;  %v1179_v28 = vld [vmem:[#allocation5 + $0x40] sm:$0xff]  }
  0x3d   :  { %1034 = vmatprep.subr.bf16.mxu1 %v1161_v10  ;;  %v1176_v25 = vld [vmem:[#allocation5 + $0x8] sm:$0xff]   ;;  %v1180_v29 = vld [vmem:[#allocation5] sm:$0xff]   ;;  %v84_v31 = vld [vmem:[#allocation2 + $0x8] sm:$0xff] }
  0x3e   :  { %1013 = vmatpush3.bf16.msra.mxu0 %v1160_v9  ;;  %v1177_v26 = vld [vmem:[#allocation5 + $0xc8] sm:$0xff]   ;;  %v1181_v30 = vld [vmem:[#allocation5 + $0xc0] sm:$0xff]   ;;  %v91_v32 = vld [vmem:[#allocation2 + $0x40] sm:$0xff] }
  0x3f   :  { %1014 = vmatprep.subr.bf16.mxu0 %v1163_v12  ;;  %v1178_v27 = vld [vmem:[#allocation5 + $0x88] sm:$0xff]   ;;  %v98_v33 = vpack.c.bf16 %v91_v32, %v84_v31  ;;  %v1182_v34 = vld [vmem:[#allocation5 + $0x80] sm:$0xff]   ;;  %v83_v35 = vld [vmem:[#allocation2] sm:$0xff] }
  0x40   :  { %1035 = vmatpush3.bf16.msra.mxu1 %v1162_v11  ;;  %v90_v36 = vld [vmem:[#allocation2 + $0x38] sm:$0xff]  ;;  %v1183_v38 = vld [vmem:[#allocation5 + $0x178] sm:$0xff]   ;;  %v93_v40 = vld [vmem:[#allocation2 + $0x50] sm:$0xff] }
  0x41   :  { %1036 = vmatprep.subr.bf16.mxu1 %v1165_v14  ;;  %539 = vmatprep.mubr.bf16.mxu0 %v98_v33  ;;  %v97_v37 = vpack.c.bf16 %v90_v36, %v83_v35  ;;  %v86_v39 = vld [vmem:[#allocation2 + $0x18] sm:$0xff]  ;;  %v1184_v42 = vld [vmem:[#allocation5 + $0x138] sm:$0xff]   ;;  %v85_v44 = vld [vmem:[#allocation2 + $0x10] sm:$0xff] }
  0x42   :  { %1015 = vmatpush3.bf16.msra.mxu0 %v1164_v13  ;;  %v100_v41 = vpack.c.bf16 %v93_v40, %v86_v39  ;;  %v92_v45 = vld [vmem:[#allocation2 + $0x48] sm:$0xff]  ;;  %v1185_v47 = vld [vmem:[#allocation5 + $0x170] sm:$0xff]   ;;  %v1187_v49 = vld [vmem:[#allocation5 + $0x168] sm:$0xff]  }
  0x43   :  { %1016 = vmatprep.subr.bf16.mxu0 %v1167_v16  ;;  %v99_v46 = vpack.c.bf16 %v92_v45, %v85_v44  ;;  %v1186_v48 = vld [vmem:[#allocation5 + $0x130] sm:$0xff]   ;;  %v1188_v50 = vld [vmem:[#allocation5 + $0x128] sm:$0xff]   ;;  %v1189_v51 = vld [vmem:[#allocation5 + $0x160] sm:$0xff]  }
  0x44   :  { %1037 = vmatpush3.bf16.msra.mxu1 %v1166_v15  ;;  %580 = vmatprep.mubr.bf16.mxu1 %v100_v41  ;;  %v1190_v52 = vld [vmem:[#allocation5 + $0x120] sm:$0xff]   ;;  %v1191_v53 = vld [vmem:[#allocation5 + $0x158] sm:$0xff]   ;;  %v1193_v55 = vld [vmem:[#allocation5 + $0x150] sm:$0xff]  }
  0x45   :  { %1038 = vmatprep.subr.bf16.mxu1 %v1169_v18  ;;  %v1192_v54 = vld [vmem:[#allocation5 + $0x118] sm:$0xff]   ;;  %v1199_v56 = vld [vmem:[#allocation5 + $0x180] sm:$0xff]   ;;  %v1194_v58 = vld [vmem:[#allocation5 + $0x110] sm:$0xff]  }
  0x46   :  { %1017 = vmatpush3.bf16.msra.mxu0 %v1168_v17  ;;  %v88_v57 = vld [vmem:[#allocation2 + $0x28] sm:$0xff]  ;;  %v1195_v59 = vld [vmem:[#allocation5 + $0x148] sm:$0xff]   ;;  %v95_v60 = vld [vmem:[#allocation2 + $0x60] sm:$0xff] }
  0x47   :  { %1018 = vmatprep.subr.bf16.mxu0 %v1171_v20  ;;  %v102_v61 = vpack.c.bf16 %v95_v60, %v88_v57  ;;  %v89_v62 = vld [vmem:[#allocation2 + $0x30] sm:$0xff]  ;;  %v96_v63 = vld [vmem:[#allocation2 + $0x68] sm:$0xff]  ;;  %v1196_v1 = vld [vmem:[#allocation5 + $0x108] sm:$0xff]  }
  0x48   :  { %1039 = vmatpush3.bf16.msra.mxu1 %v1170_v19  ;;  %v103_v0 = vpack.c.bf16 %v96_v63, %v89_v62  ;;  %v1197_v2 = vld [vmem:[#allocation5 + $0x140] sm:$0xff]   ;;  %v87_v4 = vld [vmem:[#allocation2 + $0x20] sm:$0xff]  ;;  %v94_v5 = vld [vmem:[#allocation2 + $0x58] sm:$0xff] }
  0x49   :  { %1040 = vmatprep.subr.bf16.mxu1 %v1173_v22  ;;  %v1198_v3 = vld [vmem:[#allocation5 + $0x100] sm:$0xff]   ;;  %v101_v6 = vpack.c.bf16 %v94_v5, %v87_v4  ;;  %v1201_v8 = vld [vmem:[#allocation7 + $0x30] sm:$0xff]   ;;  %v1202_v9 = vld [vmem:[#allocation7 + $0x28] sm:$0xff]  }
  0x4a   :  { %1019 = vmatpush3.bf16.msra.mxu0 %v1172_v21  ;;  %v1200_v7 = vld [vmem:[#allocation7 + $0x38] sm:$0xff]   ;;  %v1203_v10 = vld [vmem:[#allocation7 + $0x20] sm:$0xff]   ;;  %v1205_v12 = vld [vmem:[#allocation7 + $0x10] sm:$0xff]  }
  0x4b   :  { %1020 = vmatprep.subr.bf16.mxu0 %v1175_v24  ;;  %v1204_v11 = vld [vmem:[#allocation7 + $0x18] sm:$0xff]   ;;  %v1206_v13 = vld [vmem:[#allocation7 + $0x8] sm:$0xff]   ;;  %v1207_v14 = vld [vmem:[#allocation7] sm:$0xff]  }
  0x4c   :  { %1041 = vmatpush3.bf16.msra.mxu1 %v1174_v23  ;;  %v1208_v15 = vld [vmem:[#allocation8 + $0x38] sm:$0xff]   ;;  %v1209_v16 = vld [vmem:[#allocation8 + $0x30] sm:$0xff]   ;;  %v1210_v17 = vld [vmem:[#allocation8 + $0x28] sm:$0xff]  }
  0x4d   :  { %1042 = vmatprep.subr.bf16.mxu1 %v1177_v26  ;;  %v1211_v18 = vld [vmem:[#allocation8 + $0x20] sm:$0xff]   ;;  %v1212_v19 = vld [vmem:[#allocation8 + $0x18] sm:$0xff]   ;;  %v930_v32 = vld [vmem:[%s1436_s2] ss:$0 sm:$0xff] }
  0x4e   :  { %1021 = vmatpush3.bf16.msra.mxu0 %v1176_v25  ;;  %v1215_v57 = vld [vmem:[#allocation8] sm:$0xff]  }
  0x4f   :  { %1022 = vmatprep.subr.bf16.mxu0 %v1179_v28 }
  0x50   :  { %1043 = vmatpush3.bf16.msra.mxu1 %v1178_v27 }
  0x51   :  { %1044 = vmatprep.subr.bf16.mxu1 %v1181_v30 }
  0x52   :  { %1023 = vmatpush3.bf16.msra.mxu0 %v1180_v29 }
  0x53   :  { %1052 = vmatprep.subr.bf16.mxu0 %v1183_v38 }
  0x54   :  { %1045 = vmatpush3.bf16.msra.mxu1 %v1182_v34 }
  0x55   :  { %1094 = vmatprep.subr.bf16.mxu1 %v1332_v43  ;;  %540 = vmatmul.mubr.bf16.vlgmr.msra.gmra.mxu0 %v97_v37 }
  0x56   :  { %1053 = vmatpush3.bf16.msra.mxu0 %v1184_v42  ;;  %621 = vmatprep.mubr.bf16.mxu0 %v102_v61 }
  0x57   :  { %581 = vmatmul.mubr.bf16.vlgmr.msra.gmra.mxu1 %v99_v46  ;;  %1054 = vmatprep.subr.bf16.mxu0 %v1185_v47 }
  0x58   :  { %1096 = vmatprep.mubr.msk.bf16.mxu1 %vm1333_vm0, %v1332_v43  ;;  %1095 = vmatpush3.bf16.msra.mxu1 %v1199_v56  ;;  %v1214_v56 = vld [vmem:[#allocation8 + $0x8] sm:$0xff]  }
  0x59   :  { %1100 = vmatprep.subr.bf16.mxu1 %v1332_v43 }
  0x5a   :  { %1055 = vmatpush3.bf16.msra.mxu0 %v1186_v48 }
  0x5b   :  { %1056 = vmatprep.subr.bf16.mxu0 %v1187_v49 }
  0x5e   :  { %1057 = vmatpush3.bf16.msra.mxu0 %v1188_v50 }
  0x5f   :  { %1058 = vmatprep.subr.bf16.mxu0 %v1189_v51  ;;  %1097 = vmatmul.mubr.msk.bf16.vlgmr.msra.gmra.mxu1 %vm503_vm1, %v103_v0 }
  0x60   :  { %1116 = vmatprep.mubr.msk.bf16.mxu1 %vm1333_vm0, %v1332_v43  ;;  %1101 = vmatpush3.bf16.msra.mxu1 %v1200_v7 }
  0x61   :  { %1102 = vmatprep.subr.bf16.mxu1 %v1332_v43 }
  0x62   :  { %1059 = vmatpush3.bf16.msra.mxu0 %v1190_v52 }
  0x63   :  { %1060 = vmatprep.subr.bf16.mxu0 %v1191_v53 }
  0x64   :  { %1103 = vmatpush3.bf16.msra.mxu1 %v1201_v8 }
  0x65   :  { %1104 = vmatprep.subr.bf16.mxu1 %v1332_v43 }
  0x66   :  { %1061 = vmatpush3.bf16.msra.mxu0 %v1192_v54 }
  0x67   :  { %1062 = vmatprep.subr.bf16.mxu0 %v1193_v55  ;;  %v1213_v55 = vld [vmem:[#allocation8 + $0x10] sm:$0xff]  }
  0x68   :  { %1105 = vmatpush3.bf16.msra.mxu1 %v1202_v9 }
  0x69   :  { %1106 = vmatprep.subr.bf16.mxu1 %v1332_v43 }
  0x6a   :  { %1063 = vmatpush3.bf16.msra.mxu0 %v1194_v58  ;;  %v981_v58 = vld [vmem:[%s1438_s4] ss:$0 sm:$0xff]  ;;  %s1296_s4 = scalar_lea.vmem %s917_s29, 128 }
  0x6b   :  { %1064 = vmatprep.subr.bf16.mxu0 %v1195_v59  ;;  %p1297_p6 = scmp.ne.s32.totalorder %s917_s29, %s1296_s4  ;;  %p1302_p8 = scmp.lt.s32.totalorder %s1296_s4, %s1296_s4 }
  0x6c   :  { %1107 = vmatpush3.bf16.msra.mxu1 %v1203_v10 }
  0x6d   :  { %1108 = vmatprep.subr.bf16.mxu1 %v1332_v43  ;;  %p1303_p9 = por %p1302_p8, %p1301_p7 }
  0x6e   :  { %1065 = vmatpush3.bf16.msra.mxu0 %v1196_v1 }
  0x6f   :  { %1066 = vmatprep.subr.bf16.mxu0 %v1197_v2  ;;  %p1304_p10 = pnand %p1303_p9, %p1297_p6 }
  0x70   :  { %1109 = vmatpush3.bf16.msra.mxu1 %v1204_v11 }
  0x71   :  { %1110 = vmatprep.subr.bf16.mxu1 %v1332_v43 }
  0x72   :  { %1067 = vmatpush3.bf16.msra.mxu0 %v1198_v3 }
  0x73   :  { %1120 = vmatprep.subr.bf16.mxu0 %v1332_v43 }
  0x74   :  { %1111 = vmatpush3.bf16.msra.mxu1 %v1205_v12 }
  0x75   :  { %622 = vmatmul.mubr.bf16.vlgmr.msra.gmra.mxu0 %v101_v6  ;;  %1112 = vmatprep.subr.bf16.mxu1 %v1332_v43 }
  0x76   :  { %1136 = vmatprep.mubr.msk.bf16.mxu0 %vm1333_vm0, %v1332_v43  ;;  %1121 = vmatpush3.bf16.msra.mxu0 %v1208_v15 }
  0x77   :  { %1122 = vmatprep.subr.bf16.mxu0 %v1332_v43 }
  0x78   :  { %1113 = vmatpush3.bf16.msra.mxu1 %v1206_v13 }
  0x79   :  { %1114 = vmatprep.subr.bf16.mxu1 %v1332_v43 }
  0x7a   :  { %1123 = vmatpush3.bf16.msra.mxu0 %v1209_v16 }
  0x7b   :  { %1124 = vmatprep.subr.bf16.mxu0 %v1332_v43 }
  0x7c   :  { %1115 = vmatpush3.bf16.msra.mxu1 %v1207_v14 }
  0x7e   :  { %1125 = vmatpush3.bf16.msra.mxu0 %v1210_v17 }
  0x7f   :  { %1126 = vmatprep.subr.bf16.mxu0 %v1332_v43 }
  0x82   :  { %1127 = vmatpush3.bf16.msra.mxu0 %v1211_v18 }
  0x83   :  { %1128 = vmatprep.subr.bf16.mxu0 %v1332_v43 }
  0x86   :  { %1129 = vmatpush3.bf16.msra.mxu0 %v1212_v19 }
  0x87   :  { %1130 = vmatprep.subr.bf16.mxu0 %v1332_v43 }
  0x8a   :  { %1131 = vmatpush3.bf16.msra.mxu0 %v1213_v55 }
  0x8b   :  { %1132 = vmatprep.subr.bf16.mxu0 %v1332_v43 }
  0x8e   :  { %1133 = vmatpush3.bf16.msra.mxu0 %v1214_v56 }
  0x8f   :  { %1134 = vmatprep.subr.bf16.mxu0 %v1332_v43  ;;  %v990_v43 = vld [vmem:[%s1440_s6] ss:$0 sm:$0xff] }
  0x92   :  { %1135 = vmatpush3.bf16.msra.mxu0 %v1215_v57 }
 0x115   :  { %v1024_v23 = vpop.f32.mrf.mxu0 }
 0x117   :  { %v1046_v20 = vpop.f32.mrf.mxu1  ;;  %v1025_v25 = vpop.f32.mrf.mxu0 }
 0x118   :  { %v1026_v31 = vadd.f32 %v1025_v25, %v1024_v23 }
 0x119   :  { %v1047_v21 = vpop.f32.mrf.mxu1  ;;  %v1027_v28 = vpop.f32.mrf.mxu0 }
 0x11a   :  { %v542_v34 = vadd.f32 %v1026_v31, %v930_v32  ;;  %v1048_v35 = vadd.f32 %v1047_v21, %v1046_v20 }
 0x11b   :  { %v1049_v22 = vpop.f32.mrf.mxu1  ;;  %v1028_v33 = vpop.f32.mrf.mxu0 }
 0x11c   :  { %v1029_v36 = vadd.f32 %v1028_v33, %v1027_v28  ;;  %v583_v39 = vadd.f32 %v1048_v35, %v542_v34 }
 0x11d   :  { %v1050_v24 = vpop.f32.mrf.mxu1 }
 0x11e   :  { %v545_v40 = vadd.f32 %v1029_v36, %v930_v32  ;;  %v1051_v41 = vadd.f32 %v1050_v24, %v1049_v22 }
 0x11f   :  { %v664_v26 = vpop.f32.mrf.mxu1 }
 0x120   :  { %v586_v47 = vadd.f32 %v1051_v41, %v545_v40 }
 0x121   :  { %v1098_v27 = vpop.f32.mrf.mxu1 }
 0x123   :  { %v667_v29 = vpop.f32.mrf.mxu1 }
 0x125   :  { %v1099_v30 = vpop.f32.mrf.mxu1 }
 0x135   :  { %v1068_v37 = vpop.f32.mrf.mxu0 }
 0x137   :  { %v1069_v38 = vpop.f32.mrf.mxu0 }
 0x138   :  { %v1070_v42 = vadd.f32 %v1069_v38, %v1068_v37 }
 0x139   :  { %v1071_v44 = vpop.f32.mrf.mxu0 }
 0x13a   :  { %v624_v45 = vadd.f32 %v1070_v42, %v583_v39 }
 0x13b   :  { %v1072_v46 = vpop.f32.mrf.mxu0 }
 0x13c   :  { %v1073_v48 = vadd.f32 %v1072_v46, %v1071_v44  ;;  %v665_v49 = vadd.f32 %v664_v26, %v624_v45 }
 0x13e   :  { %v627_v50 = vadd.f32 %v1073_v48, %v586_v47  ;;  %v671_v52 = vmax.f32 %v665_v49, 0.0 }
 0x140   :  { %v668_v51 = vadd.f32 %v667_v29, %v627_v50 }
 0x142   :  { %v672_v53 = vmax.f32 %v668_v51, 0.0 }
 0x144   :  { %v673_v54 = vpack.c.bf16 %v672_v53, %v671_v52 }
 0x146   :  { %1117 = vmatmul.mubr.bf16.vlgmr.msra.gmra.mxu1 %v673_v54 }
 0x206   :  { %v779_v59 = vpop.f32.mrf.mxu1 }
 0x207   :  { %v780_v61 = vadd.f32 %v981_v58, %v779_v59 }
 0x208   :  { %v1118_v60 = vpop.f32.mrf.mxu1 }
 0x209   :  { %v786_v1 = vmax.f32 %v780_v61, 0.0 }
 0x20a   :  { %v782_v62 = vpop.f32.mrf.mxu1 }
 0x20b   :  { %v783_v63 = vadd.f32 %v981_v58, %v782_v62 }
 0x20c   :  { %v1119_v0 = vpop.f32.mrf.mxu1 }
 0x20d   :  { %v787_v2 = vmax.f32 %v783_v63, 0.0 }
 0x20f   :  { %v788_v3 = vpack.c.bf16 %v787_v2, %v786_v1 }
 0x211   :  { %1137 = vmatmul.mubr.bf16.vlgmr.msra.gmra.mxu0 %v788_v3 }
 0x2d1   :  { %v894_v4 = vpop.f32.mrf.mxu0 }
 0x2d2   :  { %v895_v7 = vadd.f32 %v990_v43, %v894_v4 }
 0x2d3   :  { %v1138_v5 = vpop.f32.mrf.mxu0 }
 0x2d5   :  { %v897_v6 = vpop.f32.mrf.mxu0 }
 0x2d6   :  { %v898_v8 = vadd.f32 %v990_v43, %v897_v6 }
 0x2d7   :  { %v1139_v9 = vpop.f32.mrf.mxu0 }
 0x2d8   :  { %v1006_v10 = vpack.c.bf16 %v898_v8, %v895_v7 }
 0x2da   :  { %1007 = vst [vmem:[#allocation10] sm:$0xff] %v1006_v10  }
 0x2db   :  { %1307 = shalt.err (!%p1304_p10)
}
 0x2dc   :  { %922 = dma.vmem_to_hbm [thread:$0]  %s917_s29, 128, %s1441_s7, [#allocation4], %s1325_s27, %s1325_s27, %s1326_s28  }
 0x2dd   :  { %1322 = dma.done.wait [#allocation4], 128  }
 0x2de   :  { %1323 = vsyncadd [#allocation4], 4294967168 }
 0x2df   :  { %926 = vsyncpa [#allocation3], 1 }
 0x2e0   :  { %927 = vsyncpa [#allocation6], 1 }
 0x2e1   :  { %928 = vsyncpa [#allocation9], 1 }
 0x2e2   :  { %929 = vsyncpa [#allocation4], 1 }

</bundles_post_ra>
